<compile_context>
chip_gen: v6e
topology: v6e:2x2x1
jax: 0.10.0
libtpu: 0.0.40
codegen_flags: <defaults>
</compile_context>

<pallas_src>
import functools

import jax
import jax.numpy as jnp
from jax.experimental import pallas as pl
from jax.experimental.pallas import tpu as pltpu


def _round_up(n: int, m: int) -> int:
    return (n + m - 1) // m * m


def _pad_to(a, shape):
    """Zero-pad `a` up to `shape`; no-op (no copy) when already that shape."""
    if tuple(a.shape) == tuple(shape):
        return a
    return jnp.pad(a, [(0, s - d) for d, s in zip(a.shape, shape)])


def _rnn_block_kernel(h0_ref, x_ref, wih_ref, whh_ref, bh_ref, who_ref, bo_ref,
                      out_ref, hseq_ref, h_scr, xp_scr, *, tt, b_pad):
    """One time-block (TT timesteps) per grid iteration.

    Serial work per timestep is only the (B,H)@(H,H) recurrence + tanh; the
    input and output projections are batched over the whole block.
    """
    tb = pl.program_id(0)

    # Initialize the VMEM-resident f32 hidden carry at the first block.
    @pl.when(tb == 0)
    def _():
        h_scr[...] = h0_ref[...].astype(jnp.float32)

    # Hoisted input projection for the whole time block:
    # (TT*B, I) @ (I, H) with f32 accumulation on the MXU.
    xp_scr[...] = jnp.dot(x_ref[...], wih_ref[...],
                          preferred_element_type=jnp.float32)

    bh = bh_ref[...]                    # (1, H) f32, broadcasts over rows
    whh = whh_ref[...]                  # resident recurrent weight
    h = h_scr[...]                      # f32 carry
    for t in range(tt):                 # static unroll: serial part only
        r = t * b_pad                   # sublane-aligned static row offset
        pre = xp_scr[r:r + b_pad, :] + bh + jnp.dot(
            h.astype(whh.dtype), whh, preferred_element_type=jnp.float32)
        h = jnp.tanh(pre)
        # Stage h_t directly in the h_seq output block (no extra VMEM copy).
        hseq_ref[r:r + b_pad, :] = h.astype(hseq_ref.dtype)
    h_scr[...] = h                      # carry into the next time block

    # Hoisted output projection: (TT*B, H) @ (H, O) + bias, one MXU pass.
    out_ref[...] = (
        jnp.dot(hseq_ref[...].astype(who_ref.dtype), who_ref[...],
                preferred_element_type=jnp.float32) + bo_ref[...]
    ).astype(out_ref.dtype)


def rnn_forward_seq(x_seq, h0, params, compute_dtype=jnp.bfloat16,
                    time_block=None):
    """Run the RNN cell over a whole sequence in ONE pallas_call.

    x_seq: (T, B, input_size); h0: (B, hidden_size).
    params (PyTorch Linear convention):
        w_i2h: (hidden, input)                [no bias]
        w_h2h: (hidden, hidden), b_h2h: (hidden,)
        w_h2o: (output, hidden), b_h2o: (output,)
    Returns (out_seq (T, B, output), h_seq (T, B, hidden)).

    compute_dtype controls the matmul *operand* dtype (accumulation, bias add
    and tanh stay f32).  Default bf16 = MXU fast path; jnp.float32 = strict
    parity with the float32 PyTorch module.
    Note: out/h_seq are emitted in x_seq.dtype; the f32 carry is internal.
    """
    T, B, I = x_seq.shape
    H = params["w_h2h"].shape[0]
    O = params["w_h2o"].shape[0]

    # Lane/sublane-aligned padded sizes.
    I_pad, H_pad, O_pad = (_round_up(n, 128) for n in (I, H, O))
    B_pad = _round_up(B, 8)

    # Time-block size: amortizes grid overhead and widens the batched GEMMs.
    TT = int(time_block) if time_block is not None else max(1, min(T, 16))
    T_pad = _round_up(T, TT)

    cdt = jnp.dtype(compute_dtype)
    out_dtype = x_seq.dtype
    rows = TT * B_pad
    n_blocks = T_pad // TT

    # Weights pre-transposed to (in, out), cast once, zero-padded (padded
    # rows/cols are zero so padded hidden lanes stay exactly 0). Biases f32.
    w_ih = _pad_to(params["w_i2h"].T.astype(cdt), (I_pad, H_pad))
    w_hh = _pad_to(params["w_h2h"].T.astype(cdt), (H_pad, H_pad))
    w_ho = _pad_to(params["w_h2o"].T.astype(cdt), (H_pad, O_pad))
    b_h = _pad_to(params["b_h2h"].astype(jnp.float32)[None, :], (1, H_pad))
    b_o = _pad_to(params["b_h2o"].astype(jnp.float32)[None, :], (1, O_pad))

    # Activations: cast once to the operand dtype, pad only if needed, then
    # flatten (t, b) rows so kernel blocks are plain 2-D lane-dense tiles.
    x_p = _pad_to(x_seq.astype(cdt), (T_pad, B_pad, I_pad))
    x_p = x_p.reshape(T_pad * B_pad, I_pad)
    h0_p = _pad_to(h0.astype(jnp.float32), (B_pad, H_pad))

    kernel = functools.partial(_rnn_block_kernel, tt=TT, b_pad=B_pad)

    # Size the scoped-VMEM limit from actual residency (+ headroom), capped
    # at 64 MiB so it is valid on v7x as well.
    itm = cdt.itemsize
    oitm = jnp.dtype(out_dtype).itemsize
    resident = (
        2 * rows * (I_pad * itm + (O_pad + H_pad) * oitm)        # pipelined blocks
        + 2 * ((I_pad + H_pad) * H_pad + H_pad * O_pad) * itm    # weights (dbl-buf)
        + 2 * (H_pad + O_pad) * 4 + 2 * B_pad * H_pad * 4        # biases, h0
        + (B_pad + rows) * H_pad * 4                             # scratch
    )
    vmem_limit = int(min(max(2 * resident + (4 << 20), 16 << 20), 64 << 20))

    out_p, h_p = pl.pallas_call(
        kernel,
        out_shape=(
            jax.ShapeDtypeStruct((T_pad * B_pad, O_pad), out_dtype),
            jax.ShapeDtypeStruct((T_pad * B_pad, H_pad), out_dtype),
        ),
        grid=(n_blocks,),
        in_specs=[
            # h0: read only at tb == 0; constant block -> single DMA.
            pl.BlockSpec((B_pad, H_pad), lambda tb: (0, 0)),
            # x: one time-block slab per grid step.
            pl.BlockSpec((rows, I_pad), lambda tb: (tb, 0)),
            # Weights / biases: constant index_map -> VMEM-resident for all T.
            pl.BlockSpec((I_pad, H_pad), lambda tb: (0, 0)),
            pl.BlockSpec((H_pad, H_pad), lambda tb: (0, 0)),
            pl.BlockSpec((1, H_pad), lambda tb: (0, 0)),
            pl.BlockSpec((H_pad, O_pad), lambda tb: (0, 0)),
            pl.BlockSpec((1, O_pad), lambda tb: (0, 0)),
        ],
        out_specs=(
            pl.BlockSpec((rows, O_pad), lambda tb: (tb, 0)),
            pl.BlockSpec((rows, H_pad), lambda tb: (tb, 0)),
        ),
        scratch_shapes=[
            pltpu.VMEM((B_pad, H_pad), jnp.float32),   # f32 hidden carry
            pltpu.VMEM((rows, H_pad), jnp.float32),    # block x-projections
        ],
        compiler_params=pltpu.CompilerParams(
            # Time is a true sequential dependency (carry in scratch).
            dimension_semantics=("arbitrary",),
            vmem_limit_bytes=vmem_limit,
        ),
    )(h0_p, x_p, w_ih, w_hh, b_h, w_ho, b_o)

    out_seq = out_p.reshape(T_pad, B_pad, O_pad)
    h_seq = h_p.reshape(T_pad, B_pad, H_pad)
    # Strip padding only when it exists (no extra HBM copy for aligned shapes).
    if (T_pad, B_pad, O_pad) != (T, B, O):
        out_seq = out_seq[:T, :B, :O]
    if (T_pad, B_pad, H_pad) != (T, B, H):
        h_seq = h_seq[:T, :B, :H]
    return out_seq, h_seq


def rnn_forward(x, hidden_state, params, compute_dtype=jnp.bfloat16):
    """Single-step forward, exactly matching the PyTorch module signature.

    x: (B, input_size), hidden_state: (B, hidden_size).
    Returns (out (B, output_size), new_hidden (B, hidden_size)).
    """
    out_seq, h_seq = rnn_forward_seq(x[None], hidden_state, params,
                                     compute_dtype=compute_dtype, time_block=1)
    return out_seq[0], h_seq[0]


def init_params(key, input_size, hidden_size, output_size, dtype=jnp.float32):
    """Deterministic synthetic parameter init (PyTorch Linear shape convention)."""
    k1, k2, k3, k4, k5 = jax.random.split(key, 5)
    scale = 0.1
    return {
        "w_i2h": scale * jax.random.normal(k1, (hidden_size, input_size), dtype),
        "w_h2h": scale * jax.random.normal(k2, (hidden_size, hidden_size), dtype),
        "b_h2h": scale * jax.random.normal(k3, (hidden_size,), dtype),
        "w_h2o": scale * jax.random.normal(k4, (output_size, hidden_size), dtype),
        "b_h2o": scale * jax.random.normal(k5, (output_size,), dtype),
    }


def init_zero_hidden(batch_size, hidden_size, dtype=jnp.float32):
    return jnp.zeros((batch_size, hidden_size), dtype)


def _ref_step(x, h, params):
    """Pure-JAX reference of one PyTorch forward step."""
    x_proj = x @ params["w_i2h"].T
    h_proj = h @ params["w_h2h"].T + params["b_h2h"]
    h_new = jnp.tanh(x_proj + h_proj)
    out = h_new @ params["w_h2o"].T + params["b_h2o"]
    return out, h_new


if __name__ == "__main__":
    input_size, hidden_size, output_size = 16, 32, 8
    batch_size, seq_len = 2, 8

    key = jax.random.PRNGKey(0)
    pkey, xkey = jax.random.split(key)
    params = init_params(pkey, input_size, hidden_size, output_size)

    x_seq = jax.random.normal(xkey, (seq_len, batch_size, input_size), jnp.float32)
    h0 = init_zero_hidden(batch_size, hidden_size)

    # Pure-JAX f32 reference trajectory.
    outs_ref, hs_ref = [], []
    h_ref = h0
    for t in range(seq_len):
        o_r, h_ref = _ref_step(x_seq[t], h_ref, params)
        outs_ref.append(o_r)
        hs_ref.append(h_ref)
    outs_ref = jnp.stack(outs_ref)
    hs_ref = jnp.stack(hs_ref)

    # --- Strict float32 parity path (single step + full sequence) ---------
    step_f32 = jax.jit(functools.partial(rnn_forward, compute_dtype=jnp.float32))
    out1, h1 = step_f32(x_seq[0], h0, params)
    jax.block_until_ready((out1, h1))
    assert jnp.allclose(out1, outs_ref[0], atol=1e-5), "single-step output mismatch"
    assert jnp.allclose(h1, hs_ref[0], atol=1e-5), "single-step hidden mismatch"

    seq_f32 = jax.jit(functools.partial(rnn_forward_seq, compute_dtype=jnp.float32))
    out_seq_f32, h_seq_f32 = seq_f32(x_seq, h0, params)
    jax.block_until_ready((out_seq_f32, h_seq_f32))
    assert jnp.allclose(out_seq_f32, outs_ref, atol=1e-5), "seq output mismatch (f32)"
    assert jnp.allclose(h_seq_f32, hs_ref, atol=1e-5), "seq hidden mismatch (f32)"

    # --- Default bf16-operand fast path (f32 accumulation, looser tol) ----
    seq_bf16 = jax.jit(rnn_forward_seq)
    out_seq_bf, h_seq_bf = seq_bf16(x_seq, h0, params)
    jax.block_until_ready((out_seq_bf, h_seq_bf))
    assert jnp.allclose(out_seq_bf, outs_ref, atol=5e-2, rtol=5e-2), \
        "seq output mismatch (bf16 operands)"
    assert jnp.allclose(h_seq_bf, hs_ref, atol=5e-2, rtol=5e-2), \
        "seq hidden mismatch (bf16 operands)"

    print("KERNEL_OK")
</pallas_src>

<mosaic_0001>
module attributes {stable_mosaic.version = 11 : i64} {
  func.func @_rnn_block_kernel(%arg0: i32, %arg1: memref<8x128xf32, #tpu.memory_space<vmem>>, %arg2: memref<8x128xf32, #tpu.memory_space<vmem>>, %arg3: memref<128x128xf32, #tpu.memory_space<vmem>>, %arg4: memref<128x128xf32, #tpu.memory_space<vmem>>, %arg5: memref<1x128xf32, #tpu.memory_space<vmem>>, %arg6: memref<128x128xf32, #tpu.memory_space<vmem>>, %arg7: memref<1x128xf32, #tpu.memory_space<vmem>>, %arg8: memref<8x128xf32, #tpu.memory_space<vmem>>, %arg9: memref<8x128xf32, #tpu.memory_space<vmem>>, %arg10: memref<8x128xf32, #tpu.memory_space<vmem>>, %arg11: memref<8x128xf32, #tpu.memory_space<vmem>>) attributes {dimension_semantics = [#tpu.dimension_semantics<arbitrary>], iteration_bounds = array<i64: 1>, scalar_prefetch = 0 : i64, scratch_operands = 2 : i64, tpu.core_type = #tpu.core_type<tc>, window_params = [{pipeline_mode = #tpu.pipeline_mode<synchronous>, transform_indices = @transform_0, window_bounds = array<i64: 8, 128>}, {transform_indices = @transform_1, window_bounds = array<i64: 8, 128>}, {pipeline_mode = #tpu.pipeline_mode<synchronous>, transform_indices = @transform_2, window_bounds = array<i64: 128, 128>}, {pipeline_mode = #tpu.pipeline_mode<synchronous>, transform_indices = @transform_3, window_bounds = array<i64: 128, 128>}, {pipeline_mode = #tpu.pipeline_mode<synchronous>, transform_indices = @transform_4, window_bounds = array<i64: 1, 128>}, {pipeline_mode = #tpu.pipeline_mode<synchronous>, transform_indices = @transform_5, window_bounds = array<i64: 128, 128>}, {pipeline_mode = #tpu.pipeline_mode<synchronous>, transform_indices = @transform_6, window_bounds = array<i64: 1, 128>}, {transform_indices = @transform_7, window_bounds = array<i64: 8, 128>}, {transform_indices = @transform_8, window_bounds = array<i64: 8, 128>}]} {
    %c0_i32 = arith.constant 0 : i32
    %0 = arith.cmpi eq, %arg0, %c0_i32 : i32
    %1 = arith.extui %0 : i1 to i32
    %c0_i32_0 = arith.constant 0 : i32
    %2 = arith.cmpi ne, %1, %c0_i32_0 : i32
    scf.if %2 {
      %c0_28 = arith.constant 0 : index
      %c0_29 = arith.constant 0 : index
      %25 = vector.load %arg1[%c0_28, %c0_29] : memref<8x128xf32, #tpu.memory_space<vmem>>, vector<8x128xf32>
      %c0_30 = arith.constant 0 : index
      %c0_31 = arith.constant 0 : index
      %26 = vector.load %arg10[%c0_30, %c0_31] : memref<8x128xf32, #tpu.memory_space<vmem>>, vector<8x128xf32>
      tpu.vector_store %arg10[%c0_30, %c0_31], %25 {strides = array<i32>} : memref<8x128xf32, #tpu.memory_space<vmem>>, vector<8x128xf32>,
    } else {
    }
    %c0 = arith.constant 0 : index
    %c0_1 = arith.constant 0 : index
    %3 = vector.load %arg2[%c0, %c0_1] : memref<8x128xf32, #tpu.memory_space<vmem>>, vector<8x128xf32>
    %c0_2 = arith.constant 0 : index
    %c0_3 = arith.constant 0 : index
    %4 = vector.load %arg3[%c0_2, %c0_3] : memref<128x128xf32, #tpu.memory_space<vmem>>, vector<128x128xf32>
    %cst = arith.constant dense<0.000000e+00> : vector<8x128xf32>
    %5 = tpu.matmul %3, %4, %cst {dimension_numbers = #tpu.dot_dimension_numbers<[1], [0], [0], [1], [0, 0, 1, 1], [], []>} : vector<8x128xf32>, vector<128x128xf32>, vector<8x128xf32> -> vector<8x128xf32>
    %c0_4 = arith.constant 0 : index
    %c0_5 = arith.constant 0 : index
    %6 = vector.load %arg11[%c0_4, %c0_5] : memref<8x128xf32, #tpu.memory_space<vmem>>, vector<8x128xf32>
    tpu.vector_store %arg11[%c0_4, %c0_5], %5 {strides = array<i32>} : memref<8x128xf32, #tpu.memory_space<vmem>>, vector<8x128xf32>,
    %c0_6 = arith.constant 0 : index
    %c0_7 = arith.constant 0 : index
    %7 = vector.load %arg5[%c0_6, %c0_7] : memref<1x128xf32, #tpu.memory_space<vmem>>, vector<1x128xf32>
    %c0_8 = arith.constant 0 : index
    %c0_9 = arith.constant 0 : index
    %8 = vector.load %arg4[%c0_8, %c0_9] : memref<128x128xf32, #tpu.memory_space<vmem>>, vector<128x128xf32>
    %c0_10 = arith.constant 0 : index
    %c0_11 = arith.constant 0 : index
    %9 = vector.load %arg10[%c0_10, %c0_11] : memref<8x128xf32, #tpu.memory_space<vmem>>, vector<8x128xf32>
    %c0_12 = arith.constant 0 : index
    %c0_13 = arith.constant 0 : index
    %10 = vector.load %arg11[%c0_12, %c0_13] : memref<8x128xf32, #tpu.memory_space<vmem>>, vector<8x128xf32>
    %11 = vector.broadcast %7 : vector<1x128xf32> to vector<8x128xf32>
    %12 = arith.addf %10, %11 : vector<8x128xf32>
    %cst_14 = arith.constant dense<0.000000e+00> : vector<8x128xf32>
    %13 = tpu.matmul %9, %8, %cst_14 {dimension_numbers = #tpu.dot_dimension_numbers<[1], [0], [0], [1], [0, 0, 1, 1], [], []>} : vector<8x128xf32>, vector<128x128xf32>, vector<8x128xf32> -> vector<8x128xf32>
    %14 = arith.addf %12, %13 : vector<8x128xf32>
    %15 = math.tanh %14 : vector<8x128xf32>
    %c0_15 = arith.constant 0 : index
    %c0_16 = arith.constant 0 : index
    %16 = vector.load %arg9[%c0_15, %c0_16] : memref<8x128xf32, #tpu.memory_space<vmem>>, vector<8x128xf32>
    tpu.vector_store %arg9[%c0_15, %c0_16], %15 {strides = array<i32>} : memref<8x128xf32, #tpu.memory_space<vmem>>, vector<8x128xf32>,
    %c0_17 = arith.constant 0 : index
    %c0_18 = arith.constant 0 : index
    %17 = vector.load %arg10[%c0_17, %c0_18] : memref<8x128xf32, #tpu.memory_space<vmem>>, vector<8x128xf32>
    tpu.vector_store %arg10[%c0_17, %c0_18], %15 {strides = array<i32>} : memref<8x128xf32, #tpu.memory_space<vmem>>, vector<8x128xf32>,
    %c0_19 = arith.constant 0 : index
    %c0_20 = arith.constant 0 : index
    %18 = vector.load %arg9[%c0_19, %c0_20] : memref<8x128xf32, #tpu.memory_space<vmem>>, vector<8x128xf32>
    %c0_21 = arith.constant 0 : index
    %c0_22 = arith.constant 0 : index
    %19 = vector.load %arg6[%c0_21, %c0_22] : memref<128x128xf32, #tpu.memory_space<vmem>>, vector<128x128xf32>
    %cst_23 = arith.constant dense<0.000000e+00> : vector<8x128xf32>
    %20 = tpu.matmul %18, %19, %cst_23 {dimension_numbers = #tpu.dot_dimension_numbers<[1], [0], [0], [1], [0, 0, 1, 1], [], []>} : vector<8x128xf32>, vector<128x128xf32>, vector<8x128xf32> -> vector<8x128xf32>
    %c0_24 = arith.constant 0 : index
    %c0_25 = arith.constant 0 : index
    %21 = vector.load %arg7[%c0_24, %c0_25] : memref<1x128xf32, #tpu.memory_space<vmem>>, vector<1x128xf32>
    %22 = vector.broadcast %21 : vector<1x128xf32> to vector<8x128xf32>
    %23 = arith.addf %20, %22 : vector<8x128xf32>
    %c0_26 = arith.constant 0 : index
    %c0_27 = arith.constant 0 : index
    %24 = vector.load %arg8[%c0_26, %c0_27] : memref<8x128xf32, #tpu.memory_space<vmem>>, vector<8x128xf32>
    tpu.vector_store %arg8[%c0_26, %c0_27], %23 {strides = array<i32>} : memref<8x128xf32, #tpu.memory_space<vmem>>, vector<8x128xf32>,
    return
  }
  func.func @transform_0(%arg0: i32) -> (i32, i32) {
    %c0_i32 = arith.constant 0 : i32
    %c0_i32_0 = arith.constant 0 : i32
    %c0_i32_1 = arith.constant 0 : i32
    return %c0_i32, %c0_i32_0 : i32, i32
  }
  func.func @transform_1(%arg0: i32) -> (i32, i32) {
    %c0_i32 = arith.constant 0 : i32
    %c0_i32_0 = arith.constant 0 : i32
    return %arg0, %c0_i32 : i32, i32
  }
  func.func @transform_2(%arg0: i32) -> (i32, i32) {
    %c0_i32 = arith.constant 0 : i32
    %c0_i32_0 = arith.constant 0 : i32
    %c0_i32_1 = arith.constant 0 : i32
    return %c0_i32, %c0_i32_0 : i32, i32
  }
  func.func @transform_3(%arg0: i32) -> (i32, i32) {
    %c0_i32 = arith.constant 0 : i32
    %c0_i32_0 = arith.constant 0 : i32
    %c0_i32_1 = arith.constant 0 : i32
    return %c0_i32, %c0_i32_0 : i32, i32
  }
  func.func @transform_4(%arg0: i32) -> (i32, i32) {
    %c0_i32 = arith.constant 0 : i32
    %c0_i32_0 = arith.constant 0 : i32
    %c0_i32_1 = arith.constant 0 : i32
    return %c0_i32, %c0_i32_0 : i32, i32
  }
  func.func @transform_5(%arg0: i32) -> (i32, i32) {
    %c0_i32 = arith.constant 0 : i32
    %c0_i32_0 = arith.constant 0 : i32
    %c0_i32_1 = arith.constant 0 : i32
    return %c0_i32, %c0_i32_0 : i32, i32
  }
  func.func @transform_6(%arg0: i32) -> (i32, i32) {
    %c0_i32 = arith.constant 0 : i32
    %c0_i32_0 = arith.constant 0 : i32
    %c0_i32_1 = arith.constant 0 : i32
    return %c0_i32, %c0_i32_0 : i32, i32
  }
  func.func @transform_7(%arg0: i32) -> (i32, i32) {
    %c0_i32 = arith.constant 0 : i32
    %c0_i32_0 = arith.constant 0 : i32
    return %arg0, %c0_i32 : i32, i32
  }
  func.func @transform_8(%arg0: i32) -> (i32, i32) {
    %c0_i32 = arith.constant 0 : i32
    %c0_i32_0 = arith.constant 0 : i32
    return %arg0, %c0_i32 : i32, i32
  }
}

</mosaic_0001>

<bundles_post_ra>
// kernel: rnn_forward.1
= control target key start
LH: loop header
LB: loop body
LE: loop exit
PB: predicated region body
PF: predicated region fallthrough
CT: control target
= control target key end

     0   :  { %v487_v0 = vmov 0.0   ;;  %vm488_vm0 = vmmov 0   ;;  %s747_s2 = inlined_call_operand.vmem [shape: f32[128,128], index: 2, kind: input, shape index: {}]   ;;  %s748_s3 = inlined_call_operand.vmem [shape: f32[128,128], index: 3, kind: input, shape index: {}]   ;;  %s749_s1 = inlined_call_operand.vmem [shape: f32[8,128], index: 1, kind: input, shape index: {}]   ;;  %s750_s0 = inlined_call_operand.vmem [shape: f32[8,128], index: 0, kind: input, shape index: {}]   ;;  %s751_s5 = inlined_call_operand.vmem [shape: f32[128,128], index: 5, kind: input, shape index: {}]   ;;  %s752_s4 = inlined_call_operand.vmem [shape: f32[1,128], index: 4, kind: input, shape index: {}]   ;;  %s753_s8 = inlined_call_operand.vmem [shape: f32[8,128], index: 8, kind: output, shape index: {1}]   ;;  %s754_s6 = inlined_call_operand.vmem [shape: f32[1,128], index: 6, kind: input, shape index: {}]   ;;  %s755_s7 = inlined_call_operand.vmem [shape: f32[8,128], index: 7, kind: output, shape index: {0}]  }
   0x1   :  { %378 = vmatprep.subr.mxu0 %v487_v0  ;;  %413 = vmatprep.subr.mxu1 %v487_v0  ;;  %v50_v1 = vld [vmem:[%s747_s2 + $0x78] sm:$0xff]  ;;  %v49_v3 = vld [vmem:[%s747_s2 + $0x70] sm:$0xff]  ;;  %v48_v5 = vld [vmem:[%s747_s2 + $0x68] sm:$0xff] }
   0x2   :  { %v138_v2 = vld [vmem:[%s748_s3 + $0x78] sm:$0xff]  ;;  %379 = vmatpush3.msra.mxu0 %v50_v1  ;;  %v137_v4 = vld [vmem:[%s748_s3 + $0x70] sm:$0xff]  ;;  %v136_v6 = vld [vmem:[%s748_s3 + $0x68] sm:$0xff]  ;;  %410 = vmatprep.mubr.msk.f32.mxu0 %vm488_vm0, %v487_v0 }
   0x3   :  { %414 = vmatpush3.msra.mxu1 %v138_v2  ;;  %380 = vmatprep.subr.mxu0 %v487_v0  ;;  %v47_v7 = vld [vmem:[%s747_s2 + $0x60] sm:$0xff]  ;;  %v46_v9 = vld [vmem:[%s747_s2 + $0x58] sm:$0xff]  ;;  %v45_v11 = vld [vmem:[%s747_s2 + $0x50] sm:$0xff] }
   0x4   :  { %415 = vmatprep.subr.mxu1 %v487_v0  ;;  %381 = vmatpush3.msra.mxu0 %v49_v3  ;;  %v135_v8 = vld [vmem:[%s748_s3 + $0x60] sm:$0xff]  ;;  %v134_v10 = vld [vmem:[%s748_s3 + $0x58] sm:$0xff]  ;;  %v133_v12 = vld [vmem:[%s748_s3 + $0x50] sm:$0xff] }
   0x5   :  { %416 = vmatpush3.msra.mxu1 %v137_v4  ;;  %382 = vmatprep.subr.mxu0 %v487_v0  ;;  %v44_v13 = vld [vmem:[%s747_s2 + $0x48] sm:$0xff]  ;;  %v43_v15 = vld [vmem:[%s747_s2 + $0x40] sm:$0xff]  ;;  %v42_v17 = vld [vmem:[%s747_s2 + $0x38] sm:$0xff] }
   0x6   :  { %417 = vmatprep.subr.mxu1 %v487_v0  ;;  %383 = vmatpush3.msra.mxu0 %v48_v5  ;;  %v132_v14 = vld [vmem:[%s748_s3 + $0x48] sm:$0xff]  ;;  %v131_v16 = vld [vmem:[%s748_s3 + $0x40] sm:$0xff]  ;;  %v130_v18 = vld [vmem:[%s748_s3 + $0x38] sm:$0xff] }
   0x7   :  { %418 = vmatpush3.msra.mxu1 %v136_v6  ;;  %384 = vmatprep.subr.mxu0 %v487_v0  ;;  %v41_v19 = vld [vmem:[%s747_s2 + $0x30] sm:$0xff]  ;;  %v40_v21 = vld [vmem:[%s747_s2 + $0x28] sm:$0xff]  ;;  %v39_v23 = vld [vmem:[%s747_s2 + $0x20] sm:$0xff] }
   0x8   :  { %419 = vmatprep.subr.mxu1 %v487_v0  ;;  %385 = vmatpush3.msra.mxu0 %v47_v7  ;;  %v129_v20 = vld [vmem:[%s748_s3 + $0x30] sm:$0xff]  ;;  %v128_v22 = vld [vmem:[%s748_s3 + $0x28] sm:$0xff]  ;;  %v127_v24 = vld [vmem:[%s748_s3 + $0x20] sm:$0xff] }
   0x9   :  { %420 = vmatpush3.msra.mxu1 %v135_v8  ;;  %386 = vmatprep.subr.mxu0 %v487_v0  ;;  %v38_v25 = vld [vmem:[%s747_s2 + $0x18] sm:$0xff]  ;;  %v37_v27 = vld [vmem:[%s747_s2 + $0x10] sm:$0xff]  ;;  %v36_v29 = vld [vmem:[%s747_s2 + $0x8] sm:$0xff] }
   0xa   :  { %421 = vmatprep.subr.mxu1 %v487_v0  ;;  %387 = vmatpush3.msra.mxu0 %v46_v9  ;;  %v126_v26 = vld [vmem:[%s748_s3 + $0x18] sm:$0xff]  ;;  %v125_v28 = vld [vmem:[%s748_s3 + $0x10] sm:$0xff]  ;;  %v124_v30 = vld [vmem:[%s748_s3 + $0x8] sm:$0xff] }
   0xb   :  { %422 = vmatpush3.msra.mxu1 %v134_v10  ;;  %388 = vmatprep.subr.mxu0 %v487_v0  ;;  %v35_v31 = vld [vmem:[%s747_s2] sm:$0xff]  ;;  %v238_v35 = vld [vmem:[%s751_s5 + $0x78] sm:$0xff]  ;;  %v237_v36 = vld [vmem:[%s751_s5 + $0x70] sm:$0xff] }
   0xc   :  { %423 = vmatprep.subr.mxu1 %v487_v0  ;;  %389 = vmatpush3.msra.mxu0 %v45_v11  ;;  %v123_v32 = vld [vmem:[%s748_s3] sm:$0xff]  ;;  %v236_v37 = vld [vmem:[%s751_s5 + $0x68] sm:$0xff]  ;;  %v234_v39 = vld [vmem:[%s751_s5 + $0x58] sm:$0xff] }
   0xd   :  { %424 = vmatpush3.msra.mxu1 %v133_v12  ;;  %390 = vmatprep.subr.mxu0 %v487_v0  ;;  %v34_v33 = vld [vmem:[%s749_s1] sm:$0xff]  ;;  %v233_v40 = vld [vmem:[%s751_s5 + $0x50] sm:$0xff]  ;;  %v232_v41 = vld [vmem:[%s751_s5 + $0x48] sm:$0xff] }
   0xe   :  { %425 = vmatprep.subr.mxu1 %v487_v0  ;;  %391 = vmatpush3.msra.mxu0 %v44_v13  ;;  %v32_v34 = vld [vmem:[%s750_s0] sm:$0xff]  ;;  %v230_v43 = vld [vmem:[%s751_s5 + $0x38] sm:$0xff]  ;;  %v229_v44 = vld [vmem:[%s751_s5 + $0x30] sm:$0xff] }
   0xf   :  { %426 = vmatpush3.msra.mxu1 %v132_v14  ;;  %392 = vmatprep.subr.mxu0 %v487_v0  ;;  %v235_v38 = vld [vmem:[%s751_s5 + $0x60] sm:$0xff]  ;;  %v228_v45 = vld [vmem:[%s751_s5 + $0x28] sm:$0xff]  ;;  %v226_v47 = vld [vmem:[%s751_s5 + $0x18] sm:$0xff] }
  0x10   :  { %427 = vmatprep.subr.mxu1 %v487_v0  ;;  %393 = vmatpush3.msra.mxu0 %v43_v15  ;;  %v231_v42 = vld [vmem:[%s751_s5 + $0x40] sm:$0xff]  ;;  %v225_v48 = vld [vmem:[%s751_s5 + $0x10] sm:$0xff]  ;;  %v224_v49 = vld [vmem:[%s751_s5 + $0x8] sm:$0xff] }
  0x11   :  { %428 = vmatpush3.msra.mxu1 %v131_v16  ;;  %394 = vmatprep.subr.mxu0 %v487_v0  ;;  %v227_v46 = vld [vmem:[%s751_s5 + $0x20] sm:$0xff] }
  0x12   :  { %429 = vmatprep.subr.mxu1 %v487_v0  ;;  %395 = vmatpush3.msra.mxu0 %v42_v17  ;;  %v223_v50 = vld [vmem:[%s751_s5] sm:$0xff] }
  0x13   :  { %430 = vmatpush3.msra.mxu1 %v130_v18  ;;  %396 = vmatprep.subr.mxu0 %v487_v0  ;;  %v325_v51 = vld [vmem:[%s752_s4] ss:$0 sm:$0xff] }
  0x14   :  { %431 = vmatprep.subr.mxu1 %v487_v0  ;;  %397 = vmatpush3.msra.mxu0 %v41_v19  ;;  %v326_v59 = vld [vmem:[%s754_s6] ss:$0 sm:$0xff] }
  0x15   :  { %432 = vmatpush3.msra.mxu1 %v129_v20  ;;  %398 = vmatprep.subr.mxu0 %v487_v0 }
  0x16   :  { %433 = vmatprep.subr.mxu1 %v487_v0  ;;  %399 = vmatpush3.msra.mxu0 %v40_v21 }
  0x17   :  { %434 = vmatpush3.msra.mxu1 %v128_v22  ;;  %400 = vmatprep.subr.mxu0 %v487_v0 }
  0x18   :  { %435 = vmatprep.subr.mxu1 %v487_v0  ;;  %401 = vmatpush3.msra.mxu0 %v39_v23 }
  0x19   :  { %436 = vmatpush3.msra.mxu1 %v127_v24  ;;  %402 = vmatprep.subr.mxu0 %v487_v0 }
  0x1a   :  { %437 = vmatprep.subr.mxu1 %v487_v0  ;;  %403 = vmatpush3.msra.mxu0 %v38_v25 }
  0x1b   :  { %438 = vmatpush3.msra.mxu1 %v126_v26  ;;  %404 = vmatprep.subr.mxu0 %v487_v0 }
  0x1c   :  { %439 = vmatprep.subr.mxu1 %v487_v0  ;;  %405 = vmatpush3.msra.mxu0 %v37_v27 }
  0x1d   :  { %440 = vmatpush3.msra.mxu1 %v125_v28  ;;  %406 = vmatprep.subr.mxu0 %v487_v0 }
  0x1e   :  { %441 = vmatprep.subr.mxu1 %v487_v0  ;;  %407 = vmatpush3.msra.mxu0 %v36_v29 }
  0x1f   :  { %442 = vmatpush3.msra.mxu1 %v124_v30  ;;  %408 = vmatprep.subr.mxu0 %v487_v0 }
  0x20   :  { %443 = vmatprep.subr.mxu1 %v487_v0  ;;  %409 = vmatpush3.msra.mxu0 %v35_v31 }
  0x21   :  { %444 = vmatpush3.msra.mxu1 %v123_v32  ;;  %445 = vmatprep.mubr.msk.f32.mxu1 %vm488_vm0, %v487_v0 }
  0x22   :  { %411 = vmatmul.mubr.f32.vlgmr.msra.gmra.mxu0 %v34_v33  ;;  %446 = vmatmul.mubr.f32.vlgmr.msra.gmra.mxu1 %v32_v34 }
  0x23   :  { %448 = vmatprep.subr.mxu0 %v487_v0  ;;  %480 = vmatprep.mubr.msk.f32.mxu0 %vm488_vm0, %v487_v0 }
  0x24   :  { %449 = vmatpush3.msra.mxu0 %v238_v35 }
  0x25   :  { %450 = vmatprep.subr.mxu0 %v487_v0 }
  0x26   :  { %451 = vmatpush3.msra.mxu0 %v237_v36 }
  0x27   :  { %452 = vmatprep.subr.mxu0 %v487_v0 }
  0x28   :  { %453 = vmatpush3.msra.mxu0 %v236_v37 }
  0x29   :  { %454 = vmatprep.subr.mxu0 %v487_v0 }
  0x2a   :  { %455 = vmatpush3.msra.mxu0 %v235_v38 }
  0x2b   :  { %456 = vmatprep.subr.mxu0 %v487_v0 }
  0x2c   :  { %457 = vmatpush3.msra.mxu0 %v234_v39 }
  0x2d   :  { %458 = vmatprep.subr.mxu0 %v487_v0 }
  0x2e   :  { %459 = vmatpush3.msra.mxu0 %v233_v40 }
  0x2f   :  { %460 = vmatprep.subr.mxu0 %v487_v0 }
  0x30   :  { %461 = vmatpush3.msra.mxu0 %v232_v41 }
  0x31   :  { %462 = vmatprep.subr.mxu0 %v487_v0 }
  0x32   :  { %463 = vmatpush3.msra.mxu0 %v231_v42 }
  0x33   :  { %464 = vmatprep.subr.mxu0 %v487_v0 }
  0x34   :  { %465 = vmatpush3.msra.mxu0 %v230_v43 }
  0x35   :  { %466 = vmatprep.subr.mxu0 %v487_v0 }
  0x36   :  { %467 = vmatpush3.msra.mxu0 %v229_v44 }
  0x37   :  { %468 = vmatprep.subr.mxu0 %v487_v0 }
  0x38   :  { %469 = vmatpush3.msra.mxu0 %v228_v45 }
  0x39   :  { %470 = vmatprep.subr.mxu0 %v487_v0 }
  0x3a   :  { %471 = vmatpush3.msra.mxu0 %v227_v46 }
  0x3b   :  { %472 = vmatprep.subr.mxu0 %v487_v0 }
  0x3c   :  { %473 = vmatpush3.msra.mxu0 %v226_v47 }
  0x3d   :  { %474 = vmatprep.subr.mxu0 %v487_v0 }
  0x3e   :  { %475 = vmatpush3.msra.mxu0 %v225_v48 }
  0x3f   :  { %476 = vmatprep.subr.mxu0 %v487_v0 }
  0x40   :  { %477 = vmatpush3.msra.mxu0 %v224_v49 }
  0x41   :  { %478 = vmatprep.subr.mxu0 %v487_v0 }
  0x42   :  { %479 = vmatpush3.msra.mxu0 %v223_v50 }
  0xe2   :  { %v117_v52 = vpop.f32.mrf.mxu0  ;;  %v214_v53 = vpop.f32.mrf.mxu1 }
  0xe3   :  { %v147_v54 = vadd.f32 %v325_v51, %v117_v52 }
  0xe4   :  { %v412_v55 = vpop.f32.mrf.mxu0  ;;  %v447_v56 = vpop.f32.mrf.mxu1 }
  0xe5   :  { %v218_v57 = vadd.f32 %v214_v53, %v147_v54 }
  0xe7   :  { %485 = vtanh.f32 %v218_v57 }
  0xf4   :  { %v486_v58 = vpop.eup %485 }
  0xf5   :  { %220 = vst [vmem:[%s753_s8] sm:$0xff] %v486_v58  ;;  %481 = vmatmul.mubr.f32.vlgmr.msra.gmra.mxu0 %v486_v58 }
 0x1b5   :  { %v312_v60 = vpop.f32.mrf.mxu0 }
 0x1b6   :  { %v313_v61 = vadd.f32 %v326_v59, %v312_v60 }
 0x1b7   :  { %v482_v62 = vpop.f32.mrf.mxu0 }
 0x1b8   :  { %316 = vst [vmem:[%s755_s7] sm:$0xff] %v313_v61 }

</bundles_post_ra>
